<compile_context>
chip_gen: v7x
topology: tpu7x:2x2x1
jax: 0.10.0
libtpu: 0.0.40
codegen_flags: <defaults>
</compile_context>

<pallas_src>
import math

import jax
import jax.numpy as jnp
from jax.experimental import pallas as pl
from jax.experimental.pallas import tpu as pltpu

_HIGHEST = jax.lax.Precision.HIGHEST


# ----------------------------------------------------------------------------
# Pallas kernel: one-hot MXU gather of the folded table -> SiLU -> Linear #2
# ----------------------------------------------------------------------------
def timestep_embedder_kernel(ts_ref, table_ref, w2_ref, b2_ref, o_ref):
    """ts_ref: [B,1] i32; table_ref: [L,D] f32 (= pe@w1+b1); w2: [D,D]; b2: [1,D]."""
    B, D = o_ref.shape
    L = table_ref.shape[0]

    # One-hot gather: onehot[b, l] = (l == timesteps[b]).  Fully vectorized,
    # replaces the previous serialized per-row sublane copy loop.
    lane = jax.lax.broadcasted_iota(jnp.int32, (B, L), 1)
    onehot = (lane == ts_ref[...]).astype(jnp.float32)                     # [B, L]

    # Gather rows of the folded table (Linear #1 already applied); exact with
    # HIGHEST precision since the multipliers are only 0.0 / 1.0.
    h = jnp.dot(onehot, table_ref[...],
                preferred_element_type=jnp.float32, precision=_HIGHEST)    # [B, D]

    # SiLU -- kept in vregs, no VMEM scratch round trip.
    h = h * jax.nn.sigmoid(h)

    # Linear #2 (+ sublane-broadcast bias row).
    y = jnp.dot(h, w2_ref[...],
                preferred_element_type=jnp.float32, precision=_HIGHEST) + b2_ref[...]
    o_ref[...] = y.astype(o_ref.dtype)


# ----------------------------------------------------------------------------
# Glue: sinusoidal positional-encoding table (sequence_pos_encoder.pe)
# ----------------------------------------------------------------------------
def make_pe_table(max_len, d_model, dtype=jnp.float32):
    """Standard PositionalEncoding table, shape [max_len, 1, d_model]."""
    position = jnp.arange(max_len, dtype=jnp.float32)[:, None]              # [L, 1]
    div_term = jnp.exp(
        jnp.arange(0, d_model, 2, dtype=jnp.float32) * (-math.log(10000.0) / d_model)
    )                                                                        # [D/2]
    pe = jnp.zeros((max_len, d_model), dtype=jnp.float32)
    pe = pe.at[:, 0::2].set(jnp.sin(position * div_term))
    pe = pe.at[:, 1::2].set(jnp.cos(position * div_term))
    return pe[:, None, :].astype(dtype)                                      # [L, 1, D]


def fold_first_linear(pe, w1, b1):
    """Fold Linear #1 into the static PE table: table = pe2d @ w1 + b1, [L, D].

    Both operands are parameters / buffers, so in a real model this is computed
    once at init time, not per forward call.
    Weights expected in [in, out] layout (transpose PyTorch nn.Linear weights).
    """
    L, _, D = pe.shape
    pe2d = pe.reshape(L, D).astype(jnp.float32)      # drop size-1 middle dim
    return jnp.dot(pe2d, w1, precision=_HIGHEST) + b1


# ----------------------------------------------------------------------------
# Full TimestepEmbedder forward
# ----------------------------------------------------------------------------
def timestep_embedder_forward(timesteps, table, w2, b2):
    """timesteps: [B] int; table: [L, D] (pe@w1+b1); w2: [D, D] (in,out); b2: [1, D].

    Returns [1, B, D]  (== time_embed(pe[timesteps]).permute(1, 0, 2)).
    """
    B = timesteps.shape[0]
    L, D = table.shape
    ts2d = timesteps.reshape(B, 1).astype(jnp.int32)

    y = pl.pallas_call(
        timestep_embedder_kernel,
        out_shape=jax.ShapeDtypeStruct((B, D), table.dtype),
        in_specs=[
            pl.BlockSpec(memory_space=pltpu.MemorySpace.VMEM),   # timesteps [B,1] i32
            pl.BlockSpec(memory_space=pltpu.MemorySpace.VMEM),   # folded table [L,D]
            pl.BlockSpec(memory_space=pltpu.MemorySpace.VMEM),   # w2
            pl.BlockSpec(memory_space=pltpu.MemorySpace.VMEM),   # b2
        ],
        out_specs=pl.BlockSpec(memory_space=pltpu.MemorySpace.VMEM),
    )(ts2d, table, w2, b2)

    # [B, D] -> [1, B, D]: equivalent to permute(1, 0, 2) of [B, 1, D] since the
    # middle dim is 1 -- pure reshape, no data movement.
    return y.reshape(1, B, D)


if __name__ == "__main__":
    latent_dim = 32
    max_len = 64
    batch = 8

    key = jax.random.PRNGKey(0)
    k1, k2, k3, k4, kt = jax.random.split(key, 5)

    # Deterministic "Linear" parameters. Stored as [in, out]; biases as [1, out].
    scale = 1.0 / math.sqrt(latent_dim)
    w1 = jax.random.uniform(k1, (latent_dim, latent_dim), jnp.float32, -scale, scale)
    b1 = jax.random.uniform(k2, (1, latent_dim), jnp.float32, -scale, scale)
    w2 = jax.random.uniform(k3, (latent_dim, latent_dim), jnp.float32, -scale, scale)
    b2 = jax.random.uniform(k4, (1, latent_dim), jnp.float32, -scale, scale)

    pe = make_pe_table(max_len, latent_dim)                              # [64, 1, 32]
    timesteps = jax.random.randint(kt, (batch,), 0, max_len, jnp.int32)  # [8]

    # Fold Linear #1 into the PE table once (init-time in a real model).
    table = fold_first_linear(pe, w1, b1)                                # [64, 32]

    out = jax.block_until_ready(
        timestep_embedder_forward(timesteps, table, w2, b2))
    assert out.shape == (1, batch, latent_dim), out.shape

    # Cross-check against a pure-JAX reference of the original (unfolded) math.
    x_ref = pe[timesteps].reshape(batch, latent_dim)
    h_ref = jnp.dot(x_ref, w1, precision=_HIGHEST) + b1
    h_ref = h_ref * jax.nn.sigmoid(h_ref)
    y_ref = (jnp.dot(h_ref, w2, precision=_HIGHEST) + b2)
    y_ref = y_ref.reshape(batch, 1, latent_dim).transpose(1, 0, 2)
    assert jnp.allclose(out, y_ref, atol=1e-5, rtol=1e-5), "mismatch vs reference"

    print("KERNEL_OK")
</pallas_src>

<mosaic_0001>
module attributes {stable_mosaic.version = 11 : i64} {
  func.func @timestep_embedder_kernel(%arg0: memref<8x1xi32, #tpu.memory_space<vmem>>, %arg1: memref<64x32xf32, #tpu.memory_space<vmem>>, %arg2: memref<32x32xf32, #tpu.memory_space<vmem>>, %arg3: memref<1x32xf32, #tpu.memory_space<vmem>>, %arg4: memref<8x32xf32, #tpu.memory_space<vmem>>) attributes {dimension_semantics = [], scalar_prefetch = 0 : i64, scratch_operands = 0 : i64, tpu.core_type = #tpu.core_type<tc>} {
    %0 = tpu.iota {dimensions = array<i32: 1>} : vector<8x64xi32>
    %c0 = arith.constant 0 : index
    %c0_0 = arith.constant 0 : index
    %1 = vector.load %arg0[%c0, %c0_0] : memref<8x1xi32, #tpu.memory_space<vmem>>, vector<8x1xi32>
    %2 = vector.broadcast %1 : vector<8x1xi32> to vector<8x64xi32>
    %3 = arith.cmpi eq, %0, %2 : vector<8x64xi32>
    %4 = arith.extui %3 : vector<8x64xi1> to vector<8x64xi32>
    %5 = arith.sitofp %4 : vector<8x64xi32> to vector<8x64xf32>
    %c0_1 = arith.constant 0 : index
    %c0_2 = arith.constant 0 : index
    %6 = vector.load %arg1[%c0_1, %c0_2] : memref<64x32xf32, #tpu.memory_space<vmem>>, vector<64x32xf32>
    %cst = arith.constant dense<0.000000e+00> : vector<8x32xf32>
    %7 = tpu.matmul %5, %6, %cst {dimension_numbers = #tpu.dot_dimension_numbers<[1], [0], [0], [1], [0, 0, 1, 1], [], []>, precision = #tpu.contract_precision<fp32>} : vector<8x64xf32>, vector<64x32xf32>, vector<8x32xf32> -> vector<8x32xf32>
    %8 = arith.negf %7 : vector<8x32xf32>
    %9 = math.exp %8 : vector<8x32xf32>
    %cst_3 = arith.constant 1.000000e+00 : f32
    %10 = vector.broadcast %cst_3 : f32 to vector<8x32xf32>
    %11 = arith.addf %10, %9 : vector<8x32xf32>
    %12 = arith.divf %10, %11 : vector<8x32xf32>
    %13 = arith.mulf %7, %12 : vector<8x32xf32>
    %c0_4 = arith.constant 0 : index
    %c0_5 = arith.constant 0 : index
    %14 = vector.load %arg2[%c0_4, %c0_5] : memref<32x32xf32, #tpu.memory_space<vmem>>, vector<32x32xf32>
    %cst_6 = arith.constant dense<0.000000e+00> : vector<8x32xf32>
    %15 = tpu.matmul %13, %14, %cst_6 {dimension_numbers = #tpu.dot_dimension_numbers<[1], [0], [0], [1], [0, 0, 1, 1], [], []>, precision = #tpu.contract_precision<fp32>} : vector<8x32xf32>, vector<32x32xf32>, vector<8x32xf32> -> vector<8x32xf32>
    %c0_7 = arith.constant 0 : index
    %c0_8 = arith.constant 0 : index
    %16 = vector.load %arg3[%c0_7, %c0_8] : memref<1x32xf32, #tpu.memory_space<vmem>>, vector<1x32xf32>
    %17 = vector.broadcast %16 : vector<1x32xf32> to vector<8x32xf32>
    %18 = arith.addf %15, %17 : vector<8x32xf32>
    %c0_9 = arith.constant 0 : index
    %c0_10 = arith.constant 0 : index
    %19 = vector.load %arg4[%c0_9, %c0_10] : memref<8x32xf32, #tpu.memory_space<vmem>>, vector<8x32xf32>
    tpu.vector_store %arg4[%c0_9, %c0_10], %18 {strides = array<i32>} : memref<8x32xf32, #tpu.memory_space<vmem>>, vector<8x32xf32>,
    return
  }
}

</mosaic_0001>

<bundles_post_ra>
// kernel: tpu_custom_call.1
= control target key start
LH: loop header
LB: loop body
LE: loop exit
PB: predicated region body
PF: predicated region fallthrough
CT: control target
= control target key end

     0   :  { %v1530_v3 = vmov 0   ;;  %v1531_v4 = vmov 0.0|0.0   ;;  %s1751_s0 = inlined_call_operand.vmem [shape: s32[8,1], index: 0, kind: input, shape index: {}]   ;;  %s1752_s1 = inlined_call_operand.vmem [shape: f32[64,32], index: 1, kind: input, shape index: {}]   ;;  %s1753_s2 = inlined_call_operand.vmem [shape: f32[32,32], index: 2, kind: input, shape index: {}]   ;;  %s1754_s3 = inlined_call_operand.vmem [shape: f32[1,32], index: 3, kind: input, shape index: {}]   ;;  %s1755_s4 = inlined_call_operand.hbm [shape: f32[8,32], index: 4, kind: output, shape index: {}]  }
   0x1   :  { %v20_v0 = vld [vmem:[%s1751_s0] sm:$0xff]  ;;  %v28_v2 = vld [vmem:[%s1752_s1 + $0x8] sm:$0xff]  ;;  %1501 = vset.pattern.permute.xlu0 %v1530_v3  ;;  %1380 = vmatprep.subr.bf16.mxu0 %v1531_v4  ;;  %v29_v7 = vld [vmem:[%s1752_s1 + $0x10] sm:$0xff] }
   0x2   :  { %v27_v1 = vld [vmem:[%s1752_s1] sm:$0xff]  ;;  %v43_v6 = vand.u32 4294901760, %v28_v2  ;;  %v30_v8 = vld [vmem:[%s1752_s1 + $0x18] sm:$0xff]  ;;  %22 = vperm.xlu0 %1501, %v20_v0   ;;  %v46_v10 = vand.u32 4294901760, %v29_v7  ;;  %v32_v12 = vld [vmem:[%s1752_s1 + $0x28] sm:$0xff]  ;;  %1368 = vmatprep.subr.bf16.mxu1 %v1531_v4 }
   0x3   :  { %v40_v5 = vand.u32 4294901760, %v27_v1  ;;  %v31_v9 = vld [vmem:[%s1752_s1 + $0x20] sm:$0xff]  ;;  %v49_v11 = vand.u32 4294901760, %v30_v8  ;;  %v33_v14 = vld [vmem:[%s1752_s1 + $0x30] sm:$0xff]  ;;  %v34_v15 = vld [vmem:[%s1752_s1 + $0x38] sm:$0xff]  ;;  %v55_v18 = vand.u32 4294901760, %v32_v12 }
   0x4   :  { %v52_v13 = vand.u32 4294901760, %v31_v9  ;;  %v1591_v17 = vsub.f32 %v28_v2, %v43_v6 }
   0x5   :  { %v1589_v16 = vsub.f32 %v27_v1, %v40_v5  ;;  %v1593_v19 = vpack.c.bf16 %v43_v6, %v40_v5 }
   0x6   :  { %9 = vsyncpa [#allocation3], 0  ;;  %v1595_v20 = vsub.f32 %v29_v7, %v46_v10  ;;  %v1597_v21 = vsub.f32 %v30_v8, %v49_v11  ;;  %v1599_v22 = vsub.f32 %v31_v9, %v52_v13  ;;  %v58_v23 = vand.u32 4294901760, %v33_v14  ;;  %s1534_s14 = smov [#allocation2]  }
   0x7   :  { %v125_v24 = vand.u32 4294901760, %v1589_v16  ;;  %v132_v25 = vand.u32 4294901760, %v1591_v17  ;;  %v1603_v26 = vsub.f32 %v32_v12, %v55_v18  ;;  %1370 = vmatpush3.bf16.msra.mxu1 %v1593_v19  ;;  %v61_v27 = vand.u32 4294901760, %v34_v15  ;;  %s1090_s15 = sshll.u32 %s1534_s14, 4  ;;  %s1091_s15 = int_to_ptr.vmem [resolvable:$true] %s1090_s15 }
   0x8   :  { %v139_v28 = vand.u32 4294901760, %v1595_v20  ;;  %v146_v29 = vand.u32 4294901760, %v1597_v21  ;;  %v153_v30 = vand.u32 4294901760, %v1599_v22  ;;  %v1609_v31 = vsub.f32 %v33_v14, %v58_v23  ;;  %1371 = vmatprep.subr.bf16.mxu1 %v1531_v4  ;;  %v583_v14 = vld [vmem:[%s1753_s2] sm:$0xff]  ;;  %s1506_s16 = scalar_lea.vmem %s1091_s15, 128  ;;  %p1511_p1 = scmp.lt.s32.totalorder %s1091_s15, %s1091_s15 }
   0x9   :  { %v126_v32 = vsub.f32 %v1589_v16, %v125_v24  ;;  %v133_v33 = vsub.f32 %v1591_v17, %v132_v25  ;;  %v160_v34 = vand.u32 4294901760, %v1603_v26  ;;  %v1615_v35 = vsub.f32 %v34_v15, %v61_v27  ;;  %v584_v15 = vld [vmem:[%s1753_s2 + $0x8] sm:$0xff]  ;;  %p1507_p0 = scmp.ne.s32.totalorder %s1091_s15, %s1506_s16  ;;  %p1512_p2 = scmp.lt.s32.totalorder %s1506_s16, %s1506_s16 }
   0xa   :  { %v140_v36 = vsub.f32 %v1595_v20, %v139_v28  ;;  %v147_v37 = vsub.f32 %v1597_v21, %v146_v29  ;;  %v154_v38 = vsub.f32 %v1599_v22, %v153_v30  ;;  %v167_v39 = vand.u32 4294901760, %v1609_v31 }
   0xb   :  { %v127_v40 = vand.u32 4294901760, %v126_v32  ;;  %v134_v41 = vand.u32 4294901760, %v133_v33  ;;  %v161_v42 = vsub.f32 %v1603_v26, %v160_v34  ;;  %v174_v43 = vand.u32 4294901760, %v1615_v35  ;;  %p1513_p3 = por %p1512_p2, %p1511_p1 }
   0xc   :  { %v141_v44 = vand.u32 4294901760, %v140_v36  ;;  %v148_v45 = vand.u32 4294901760, %v147_v37  ;;  %v155_v47 = vand.u32 4294901760, %v154_v38  ;;  %v168_v48 = vsub.f32 %v1609_v31, %v167_v39 }
   0xd   :  { %v1381_v46 = vpack.c.bf16 %v134_v41, %v127_v40  ;;  %v1624_v49 = vpack.c.bf16 %v49_v11, %v46_v10  ;;  %v162_v51 = vand.u32 4294901760, %v161_v42  ;;  %v175_v52 = vsub.f32 %v1615_v35, %v174_v43  ;;  %p1514_p4 = pnand %p1513_p3, %p1507_p0 }
   0xe   :  { %v1384_v50 = vpack.c.bf16 %v148_v45, %v141_v44  ;;  %vm1532_vm0 = vmmov 0   ;;  %v1533_v53 = vmov 0.0   ;;  %v1393_v54 = vpack.c.bf16 %v1591_v17, %v1589_v16 }
   0xf   :  { %1382 = vmatpush3.bf16.msra.mxu0 %v1381_v46  ;;  %1223 = vmatprep.mubr.msk.f32.mxu0 %vm1532_vm0, %v1533_v53  ;;  %v1633_v55 = vpack.c.bf16 %v55_v18, %v52_v13  ;;  %v1396_v56 = vpack.c.bf16 %v1597_v21, %v1595_v20  ;;  %v1399_v57 = vpack.c.bf16 %v1603_v26, %v1599_v22  ;;  %v169_v60 = vand.u32 4294901760, %v168_v48  ;;  %v585_v21 = vld [vmem:[%s1753_s2 + $0x10] sm:$0xff]  ;;  %v586_v22 = vld [vmem:[%s1753_s2 + $0x18] sm:$0xff] }
  0x10   :  { %1383 = vmatprep.subr.bf16.mxu0 %v1531_v4  ;;  %1373 = vmatpush3.bf16.msra.mxu1 %v1624_v49  ;;  %v1402_v58 = vpack.c.bf16 %v1615_v35, %v1609_v31  ;;  %v1387_v59 = vpack.c.bf16 %v162_v51, %v155_v47  ;;  %v176_v61 = vand.u32 4294901760, %v175_v52  ;;  %v1646_v62 = vpack.c.bf16 %v61_v27, %v58_v23 }
  0x11   :  { %1374 = vmatprep.subr.bf16.mxu1 %v1531_v4  ;;  %1204 = vmatprep.mubr.msk.f32.mxu1 %vm1532_vm0, %v1533_v53  ;;  %v1417_v0 = vpack.c.bf16 %v132_v25, %v125_v24  ;;  %v1420_v1 = vpack.c.bf16 %v146_v29, %v139_v28  ;;  %v1423_v2 = vpack.c.bf16 %v160_v34, %v153_v30  ;;  %v18_v5 = vlaneseq }
  0x12   :  { %v1390_v63 = vpack.c.bf16 %v176_v61, %v169_v60  ;;  %v1426_v3 = vpack.c.bf16 %v174_v43, %v167_v39  ;;  %vm35_vm1 = vcmask 523264   ;;  %v599_v16 = vand.u32 4294901760, %v583_v14 }
  0x13   :  { %1385 = vmatpush3.bf16.msra.mxu0 %v1384_v50  ;;  %v19_v6 = vand.u32 127, %v18_v5  ;;  %v602_v17 = vand.u32 4294901760, %v584_v15  ;;  %v605_v23 = vand.u32 4294901760, %v585_v21  ;;  %v608_v24 = vand.u32 4294901760, %v586_v22 }
  0x14   :  { %1386 = vmatprep.subr.bf16.mxu0 %v1531_v4  ;;  %1376 = vmatpush3.bf16.msra.mxu1 %v1633_v55  ;;  %vm594_vm3 = vcmask 261120  }
  0x15   :  { %1377 = vmatprep.subr.bf16.mxu1 %v1531_v4  ;;  %v1697_v18 = vpack.c.bf16 %v602_v17, %v599_v16  ;;  %v686_v20 = vsub.f32 %v584_v15, %v602_v17  ;;  %v1707_v27 = vpack.c.bf16 %v608_v24, %v605_v23  ;;  %v693_v28 = vsub.f32 %v585_v21, %v605_v23 }
  0x16   :  { %v700_v29 = vsub.f32 %v586_v22, %v608_v24 }
  0x17   :  { %1388 = vmatpush3.bf16.msra.mxu0 %v1387_v59  ;;  %v687_v26 = vand.u32 4294901760, %v686_v20  ;;  %v694_v33 = vand.u32 4294901760, %v693_v28 }
  0x18   :  { %1389 = vmatprep.subr.bf16.mxu0 %v1531_v4  ;;  %1379 = vmatpush3.bf16.msra.mxu1 %v1646_v62  ;;  %v701_v34 = vand.u32 4294901760, %v700_v29  ;;  %v1456_v43 = vpack.c.bf16 %v700_v29, %v693_v28 }
  0x19   :  { %1440 = vmatprep.subr.bf16.mxu1 %v1531_v4  ;;  %v688_v31 = vsub.f32 %v686_v20, %v687_v26  ;;  %v695_v36 = vsub.f32 %v693_v28, %v694_v33 }
  0x1a   :  { %v702_v37 = vsub.f32 %v700_v29, %v701_v34  ;;  %v1468_v45 = vpack.c.bf16 %v701_v34, %v694_v33 }
  0x1b   :  { %1391 = vmatpush3.bf16.msra.mxu0 %v1390_v63  ;;  %v689_v35 = vand.u32 4294901760, %v688_v31  ;;  %v696_v39 = vand.u32 4294901760, %v695_v36  ;;  %v1103_v63 = vld [vmem:[%s1754_s3] ss:$0 sm:$0xff] }
  0x1c   :  { %1392 = vmatprep.subr.bf16.mxu0 %v1531_v4  ;;  %v703_v40 = vand.u32 4294901760, %v702_v37 }
  0x1e   :  { %v1450_v41 = vpack.c.bf16 %v703_v40, %v696_v39 }
  0x81   :  { %v23_v7 = vpop.permute.xlu0 %22 }
  0x82   :  { %vm24_vm2 = vcmp.eq.s32.totalorder %v19_v6, %v23_v7 }
  0x83   :  { %v1098_v8 = vsel %vm24_vm2, 1.0, %v1533_v53 }
  0x84   :  { %v37_v9 = vsel %vm35_vm1, %v1098_v8, 0  ;;  %1224 = vmatmul.mubr.msk.f32.vlgmr.msra.gmra.mrb[0].mxu0 %vm35_vm1, %v1098_v8 }
  0x85   :  { %v113_v10 = vsub.f32 %v37_v9, %v37_v9  ;;  %1394 = vmatpush3.bf16.msra.mxu0 %v1393_v54  ;;  %1242 = vmatprep.mubr.msk.f32.mxu0 %vm1532_vm0, %v1533_v53 }
  0x86   :  { %1395 = vmatprep.subr.bf16.mxu0 %v1531_v4 }
  0x87   :  { %v114_v11 = vand.u32 4294901760, %v113_v10 }
  0x89   :  { %1397 = vmatpush3.bf16.msra.mxu0 %v1396_v56  ;;  %v115_v12 = vsub.f32 %v113_v10, %v114_v11 }
  0x8a   :  { %1398 = vmatprep.subr.bf16.mxu0 %v1531_v4 }
  0x8b   :  { %v116_v13 = vand.u32 4294901760, %v115_v12 }
  0x8d   :  { %1400 = vmatpush3.bf16.msra.mxu0 %v1399_v57  ;;  %1205 = vmatmul.mubr.f32.vlgmr.msra.gmra.mrb[0].mxu1 %v116_v13 }
  0x8e   :  { %1401 = vmatprep.subr.bf16.mxu0 %v1531_v4  ;;  %1310 = vmatprep.mubr.msk.f32.mxu1 %vm1532_vm0, %v1533_v53 }
  0x8f   :  { %1442 = vmatpush3.bf16.msra.mxu1 %v1697_v18 }
  0x90   :  { %1443 = vmatprep.subr.bf16.mxu1 %v1531_v4 }
  0x91   :  { %1403 = vmatpush3.bf16.msra.mxu0 %v1402_v58 }
  0x92   :  { %1404 = vmatprep.subr.bf16.mxu0 %v1531_v4 }
  0x93   :  { %1445 = vmatpush3.bf16.msra.mxu1 %v1707_v27 }
  0x94   :  { %1243 = vmatmul.mubr.f32.vlgmr.msra.gmra.mrb[0].mxu0 %v113_v10  ;;  %1446 = vmatprep.subr.bf16.mxu1 %v1531_v4 }
  0x95   :  { %1406 = vmatpush3.bf16.msra.mxu0 %v1593_v19  ;;  %1261 = vmatprep.mubr.msk.f32.mxu0 %vm1532_vm0, %v1533_v53 }
  0x96   :  { %1407 = vmatprep.subr.bf16.mxu0 %v1531_v4 }
  0x99   :  { %1409 = vmatpush3.bf16.msra.mxu0 %v1624_v49 }
  0x9a   :  { %1410 = vmatprep.subr.bf16.mxu0 %v1531_v4 }
  0x9d   :  { %1412 = vmatpush3.bf16.msra.mxu0 %v1633_v55 }
  0x9e   :  { %1413 = vmatprep.subr.bf16.mxu0 %v1531_v4 }
  0xa1   :  { %1415 = vmatpush3.bf16.msra.mxu0 %v1646_v62 }
  0xa2   :  { %1416 = vmatprep.subr.bf16.mxu0 %v1531_v4 }
  0xa4   :  { %1262 = vmatmul.mubr.f32.vlgmr.msra.gmra.mrb[0].mxu0 %v114_v11 }
  0xa5   :  { %1418 = vmatpush3.bf16.msra.mxu0 %v1417_v0  ;;  %1280 = vmatprep.mubr.msk.f32.mxu0 %vm1532_vm0, %v1533_v53 }
  0xa6   :  { %1419 = vmatprep.subr.bf16.mxu0 %v1531_v4 }
  0xa9   :  { %1421 = vmatpush3.bf16.msra.mxu0 %v1420_v1 }
  0xaa   :  { %1422 = vmatprep.subr.bf16.mxu0 %v1531_v4 }
  0xad   :  { %1424 = vmatpush3.bf16.msra.mxu0 %v1423_v2 }
  0xae   :  { %1425 = vmatprep.subr.bf16.mxu0 %v1531_v4 }
  0xb1   :  { %1427 = vmatpush3.bf16.msra.mxu0 %v1426_v3 }
  0xb2   :  { %1428 = vmatprep.subr.bf16.mxu0 %v1531_v4 }
  0xb4   :  { %1281 = vmatmul.mubr.msk.f32.vlgmr.msra.gmra.mrb[0].mxu0 %vm35_vm1, %v1098_v8 }
  0xb5   :  { %1430 = vmatpush3.bf16.msra.mxu0 %v1593_v19  ;;  %1299 = vmatprep.mubr.msk.f32.mxu0 %vm1532_vm0, %v1533_v53  ;;  %v679_v19 = vsub.f32 %v583_v14, %v599_v16 }
  0xb6   :  { %1431 = vmatprep.subr.bf16.mxu0 %v1531_v4 }
  0xb7   :  { %v680_v25 = vand.u32 4294901760, %v679_v19  ;;  %v1453_v42 = vpack.c.bf16 %v686_v20, %v679_v19 }
  0xb9   :  { %1433 = vmatpush3.bf16.msra.mxu0 %v1624_v49  ;;  %v681_v30 = vsub.f32 %v679_v19, %v680_v25  ;;  %v1465_v44 = vpack.c.bf16 %v687_v26, %v680_v25 }
  0xba   :  { %1434 = vmatprep.subr.bf16.mxu0 %v1531_v4 }
  0xbb   :  { %v682_v32 = vand.u32 4294901760, %v681_v30 }
  0xbd   :  { %1436 = vmatpush3.bf16.msra.mxu0 %v1633_v55  ;;  %v1447_v38 = vpack.c.bf16 %v689_v35, %v682_v32 }
  0xbe   :  { %1437 = vmatprep.subr.bf16.mxu0 %v1531_v4 }
  0xc1   :  { %1439 = vmatpush3.bf16.msra.mxu0 %v1646_v62 }
  0xc4   :  { %1300 = vmatmul.mubr.msk.f32.vlgmr.msra.gmra.mrb[0].mxu0 %vm35_vm1, %v1098_v8 }
 0x160   :  { %v118_v46 = vpop.f32.mrb[0].mxu1 }
 0x161   :  { %v1206_v47 = vpop.f32.mrb[1].mxu1 }
 0x197   :  { %v572_v48 = vpop.f32.mrb[0].mxu0 }
 0x198   :  { %v1476_v49 = vadd.f32 %v572_v48, %v118_v46  ;;  %v1301_v50 = vpop.f32.mrb[1].mxu0 }
 0x19a   :  { %v1102_v51 = vmul.f32 -1.442695, %v1476_v49 }
 0x19c   :  { %1502 = vpow2.f32 %v1102_v51 }
 0x1a6   :  { %v1503_v52 = vpop.eup %1502 }
 0x1a7   :  { %v579_v54 = vadd.f32 1.0, %v1503_v52 }
 0x1a9   :  { %1504 = vrcp.f32 %v579_v54 }
 0x1b3   :  { %v1505_v55 = vpop.eup %1504 }
 0x1b4   :  { %v582_v56 = vmul.f32 %v1505_v55, %v1476_v49 }
 0x1b6   :  { %v596_v57 = vsel %vm594_vm3, %v582_v56, 0 }
 0x1b7   :  { %v667_v58 = vand.u32 4294901760, %v596_v57 }
 0x1b9   :  { %v668_v59 = vsub.f32 %v596_v57, %v667_v58 }
 0x1bb   :  { %v669_v60 = vand.u32 4294901760, %v668_v59 }
 0x1bd   :  { %v670_v61 = vsub.f32 %v668_v59, %v669_v60 }
 0x1bf   :  { %v671_v62 = vand.u32 4294901760, %v670_v61 }
 0x1c1   :  { %1311 = vmatmul.mubr.f32.vlgmr.msra.gmra.mrb[2].mxu1 %v671_v62 }
 0x1c2   :  { %1448 = vmatpush3.bf16.msra.mxu1 %v1447_v38  ;;  %1321 = vmatprep.mubr.msk.f32.mxu1 %vm1532_vm0, %v1533_v53 }
 0x1c3   :  { %1449 = vmatprep.subr.bf16.mxu1 %v1531_v4 }
 0x1c6   :  { %1451 = vmatpush3.bf16.msra.mxu1 %v1450_v41 }
 0x1c7   :  { %1452 = vmatprep.subr.bf16.mxu1 %v1531_v4 }
 0x1c9   :  { %1322 = vmatmul.mubr.f32.vlgmr.msra.gmra.mrb[2].mxu1 %v667_v58 }
 0x1ca   :  { %1454 = vmatpush3.bf16.msra.mxu1 %v1453_v42  ;;  %1332 = vmatprep.mubr.msk.f32.mxu1 %vm1532_vm0, %v1533_v53 }
 0x1cb   :  { %1455 = vmatprep.subr.bf16.mxu1 %v1531_v4 }
 0x1ce   :  { %1457 = vmatpush3.bf16.msra.mxu1 %v1456_v43 }
 0x1cf   :  { %1458 = vmatprep.subr.bf16.mxu1 %v1531_v4 }
 0x1d1   :  { %1333 = vmatmul.mubr.f32.vlgmr.msra.gmra.mrb[2].mxu1 %v668_v59 }
 0x1d2   :  { %1460 = vmatpush3.bf16.msra.mxu1 %v1697_v18  ;;  %1343 = vmatprep.mubr.msk.f32.mxu1 %vm1532_vm0, %v1533_v53 }
 0x1d3   :  { %1461 = vmatprep.subr.bf16.mxu1 %v1531_v4 }
 0x1d6   :  { %1463 = vmatpush3.bf16.msra.mxu1 %v1707_v27 }
 0x1d7   :  { %1464 = vmatprep.subr.bf16.mxu1 %v1531_v4 }
 0x1d9   :  { %1344 = vmatmul.mubr.f32.vlgmr.msra.gmra.mrb[2].mxu1 %v669_v60 }
 0x1da   :  { %1466 = vmatpush3.bf16.msra.mxu1 %v1465_v44  ;;  %1354 = vmatprep.mubr.msk.f32.mxu1 %vm1532_vm0, %v1533_v53 }
 0x1db   :  { %1467 = vmatprep.subr.bf16.mxu1 %v1531_v4 }
 0x1de   :  { %1469 = vmatpush3.bf16.msra.mxu1 %v1468_v45 }
 0x1df   :  { %1470 = vmatprep.subr.bf16.mxu1 %v1531_v4 }
 0x1e1   :  { %1355 = vmatmul.mubr.f32.vlgmr.msra.gmra.mrb[2].mxu1 %v667_v58 }
 0x1e2   :  { %1472 = vmatpush3.bf16.msra.mxu1 %v1697_v18  ;;  %1365 = vmatprep.mubr.msk.f32.mxu1 %vm1532_vm0, %v1533_v53 }
 0x1e3   :  { %1473 = vmatprep.subr.bf16.mxu1 %v1531_v4 }
 0x1e6   :  { %1475 = vmatpush3.bf16.msra.mxu1 %v1707_v27 }
 0x1e9   :  { %1366 = vmatmul.mubr.f32.vlgmr.msra.gmra.mrb[2].mxu1 %v667_v58 }
 0x2bc   :  { %v1079_v0 = vpop.f32.mrb[2].mxu1 }
 0x2bd   :  { %v1477_v1 = vadd.f32 %v1103_v63, %v1079_v0  ;;  %v1367_v2 = vpop.f32.mrb[3].mxu1 }
 0x2bf   :  { %1083 = vst.msk [vmem:[#allocation2] sm:$0xff] %vm594_vm3, %v1477_v1 }
 0x2c0   :  { %1517 = shalt.err (!%p1514_p4)
}
 0x2c1   :  { %s1518_s19 = scalar_lea.hbm %s1755_s4, 128 }
 0x2c2   :  { %p1519_p5 = scmp.ne.s32.totalorder %s1755_s4, %s1518_s19  ;;  %p1522_p6 = scmp.lt.u32.totalorder %s1518_s19, %s1755_s4 }
 0x2c4   :  { %p1524_p7 = pnand %p1522_p6, %p1519_p5 }
 0x2c6   :  { %1527 = shalt.err (!%p1524_p7)
}
 0x2c7   :  { %1093 = dma.vmem_to_hbm [thread:$0]  %s1091_s15, 128, %s1755_s4, [#allocation3]  }
 0x2c8   :  { %1528 = dma.done.wait [#allocation3], 128  }
 0x2c9   :  { %1529 = vsyncadd [#allocation3], 4294967168 }
 0x2ca   :  { %1097 = vsyncpa [#allocation3], 1 }

</bundles_post_ra>
